<compile_context>
chip_gen: v6e
topology: v6e:2x2x1
jax: 0.10.0
libtpu: 0.0.40
codegen_flags: <defaults>
</compile_context>

<pallas_src>
import jax
import jax.numpy as jnp
from jax.experimental import pallas as pl
from jax.experimental.pallas import tpu as pltpu

N_BITS = 8
QMAX = float(2 ** N_BITS - 1)        # 255
QHALF = float(2 ** (N_BITS - 1))     # 128 (unsigned -> signed storage shift)

VMEM_LIMIT_BYTES = 32 * 1024 * 1024  # plenty for <=512x512x(tk<=2048) tiles


def _round_up(x, m):
    return (x + m - 1) // m * m


def _pick_tile(size, candidates):
    """Largest candidate that divides `size` (last candidate must divide)."""
    for t in candidates:
        if size % t == 0:
            return t
    return size


def _default_mxu_dtype():
    """int8 on chips with an integer MXU (v5e/v5p/v6e); bf16 elsewhere (v7x
    has no integer MXU; bf16 carries 8-bit integers exactly on every gen)."""
    try:
        kind = jax.devices()[0].device_kind.lower()
    except Exception:
        return jnp.bfloat16
    if ("v5" in kind) or ("v6" in kind):
        return jnp.int8
    return jnp.bfloat16


# --------------------------------------------------------------------------
# Kernel 1: activation fake-quant + per-row sum (single pass over x)
# --------------------------------------------------------------------------
def _act_quant_kernel(inv_da_ref, azp_ref, x_ref, xq_ref, xsum_ref):
    k = pl.program_id(1)
    x = x_ref[...].astype(jnp.float32)
    # x_q = clip(round(x/da) + zp_a, 0, 255) - 128, via reciprocal multiply.
    q = jnp.clip(jnp.round(x * inv_da_ref[0, 0]) + azp_ref[0, 0],
                 -QHALF, QMAX - QHALF)           # [-128, 127]
    xq_ref[...] = q.astype(xq_ref.dtype)          # MXU operand dtype (i8/bf16)

    @pl.when(k == 0)
    def _():
        xsum_ref[...] = jnp.zeros_like(xsum_ref)

    # per-row sum of quantized activations (weight zero-point correction term)
    xsum_ref[...] += jnp.sum(q, axis=1, keepdims=True)


def act_quant_pallas(x_pad, inv_a_delta, a_zp_shift, *, tm, tk, store_dtype):
    """x_pad: (M_pad, K_pad) float -> (x_q (M_pad,K_pad) store_dtype,
                                       xsum (M_pad,1) f32)."""
    M_pad, K_pad = x_pad.shape
    grid = (M_pad // tm, K_pad // tk)
    return pl.pallas_call(
        _act_quant_kernel,
        out_shape=(jax.ShapeDtypeStruct((M_pad, K_pad), store_dtype),
                   jax.ShapeDtypeStruct((M_pad, 1), jnp.float32)),
        grid=grid,
        in_specs=[
            pl.BlockSpec(memory_space=pltpu.MemorySpace.SMEM),   # 1/delta_a
            pl.BlockSpec(memory_space=pltpu.MemorySpace.SMEM),   # zp_a - 128
            pl.BlockSpec((tm, tk), lambda i, k: (i, k)),
        ],
        out_specs=(pl.BlockSpec((tm, tk), lambda i, k: (i, k)),
                   pl.BlockSpec((tm, 1), lambda i, k: (i, 0))),
        compiler_params=pltpu.CompilerParams(
            dimension_semantics=("parallel", "arbitrary"),
            vmem_limit_bytes=VMEM_LIMIT_BYTES),
    )(inv_a_delta, a_zp_shift, x_pad)


# --------------------------------------------------------------------------
# Kernel 2: integer-domain matmul + fused dequant/bias on the last K step
#   y = oscale*acc - xscale*xsum + obias
# --------------------------------------------------------------------------
def _int8_matmul_kernel(xq_ref, w_ref, xsum_ref,
                        oscale_ref, xscale_ref, obias_ref,
                        o_ref, acc_ref):
    k = pl.program_id(2)

    @pl.when(k == 0)
    def _():
        acc_ref[...] = jnp.zeros_like(acc_ref)

    acc_ref[...] += jnp.dot(xq_ref[...], w_ref[...],
                            preferred_element_type=jnp.int32)

    @pl.when(k == pl.num_programs(2) - 1)
    def _():
        o_ref[...] = (oscale_ref[...] * acc_ref[...].astype(jnp.float32)
                      - xscale_ref[...] * xsum_ref[...]
                      + obias_ref[...]).astype(o_ref.dtype)


def _bf16_matmul_kernel(xq_ref, w_ref, xsum_ref,
                        oscale_ref, xscale_ref, obias_ref,
                        o_ref):
    # f32 accumulation directly into the resident output tile (no scratch).
    k = pl.program_id(2)

    @pl.when(k == 0)
    def _():
        o_ref[...] = jnp.zeros_like(o_ref)

    o_ref[...] += jnp.dot(xq_ref[...], w_ref[...],
                          preferred_element_type=jnp.float32)

    @pl.when(k == pl.num_programs(2) - 1)
    def _():
        o_ref[...] = (oscale_ref[...] * o_ref[...]
                      - xscale_ref[...] * xsum_ref[...]
                      + obias_ref[...])


def quantized_matmul_pallas(x_q, w_q, xsum, out_scale, xsum_scale, out_bias,
                            *, tm, tn, tk, mxu_dtype):
    """x_q: (M_pad,K_pad); w_q: (K_pad,N_pad) pre-transposed; both in
    mxu_dtype. Returns (M_pad, N_pad) f32."""
    M_pad, K_pad = x_q.shape
    _, N_pad = w_q.shape
    grid = (M_pad // tm, N_pad // tn, K_pad // tk)
    # NOTE(v7x megacore): with tiny M and a single tn block the grid has only
    # one "parallel" block and one TensorCore idles; for production shapes
    # split tn so M_pad/tm * N_pad/tn >= 2.
    in_specs = [
        pl.BlockSpec((tm, tk), lambda i, j, k: (i, k)),   # x_q
        pl.BlockSpec((tk, tn), lambda i, j, k: (k, j)),   # w_q
        pl.BlockSpec((tm, 1), lambda i, j, k: (i, 0)),    # xsum
        pl.BlockSpec((1, tn), lambda i, j, k: (0, j)),    # out_scale
        pl.BlockSpec((1, tn), lambda i, j, k: (0, j)),    # xsum_scale
        pl.BlockSpec((1, tn), lambda i, j, k: (0, j)),    # out_bias
    ]
    if jnp.dtype(mxu_dtype) == jnp.dtype(jnp.int8):
        kernel = _int8_matmul_kernel
        scratch = [pltpu.VMEM((tm, tn), jnp.int32)]       # int32 accumulator
    else:
        kernel = _bf16_matmul_kernel
        scratch = []                                      # accumulate in o_ref
    return pl.pallas_call(
        kernel,
        out_shape=jax.ShapeDtypeStruct((M_pad, N_pad), jnp.float32),
        grid=grid,
        in_specs=in_specs,
        out_specs=pl.BlockSpec((tm, tn), lambda i, j, k: (i, j)),
        scratch_shapes=scratch,
        compiler_params=pltpu.CompilerParams(
            dimension_semantics=("parallel", "parallel", "arbitrary"),
            vmem_limit_bytes=VMEM_LIMIT_BYTES),
    )(x_q, w_q, xsum, out_scale, xsum_scale, out_bias)


# --------------------------------------------------------------------------
# Minimal QuantModel: one nn.Linear refactored into a QuantizedLinear,
# executed as two Pallas TPU kernels (act pre-quant + int matmul).
# --------------------------------------------------------------------------
class QuantModelPallas:
    # TODO(synk): QuantModel.forward is abstract (NotImplementedError) and the
    # refactor/save/load/bitwidth machinery (regex dispatch, SQ/Quarot/ViDiT
    # rotations) is pure module plumbing; we implement the QuantizedLinear
    # forward it installs, which is the actual compute.

    def __init__(self, in_features, out_features, key, mxu_dtype=None):
        kw, kb = jax.random.split(key)
        self.in_features = in_features
        self.out_features = out_features
        self.mxu_dtype = jnp.dtype(mxu_dtype if mxu_dtype is not None
                                   else _default_mxu_dtype())

        self.weight = jax.random.normal(
            kw, (out_features, in_features), jnp.float32) * 0.05
        self.bias = jax.random.normal(kb, (out_features,), jnp.float32) * 0.01

        # ---- per-output-channel weight quant params (asymmetric 8-bit) ----
        # TODO(synk): w_zp is intentionally left unclipped to match the in-repo
        # QuantizedLinear reference semantics.
        w_min = jnp.min(self.weight, axis=1)
        w_max = jnp.max(self.weight, axis=1)
        self.w_delta = jnp.maximum((w_max - w_min) / QMAX, 1e-8)
        self.w_zp = jnp.round(-w_min / self.w_delta)

        # quantize the weight ONCE; store transposed in the MXU operand dtype
        w_int = jnp.clip(jnp.round(self.weight / self.w_delta[:, None])
                         + self.w_zp[:, None], 0.0, QMAX)
        w_s = w_int - QHALF                       # (N, K) signed grid values

        # padded shapes: 128-multiples (minimal dead K/N), divisor-based tiles
        self.K_pad = _round_up(in_features, 128)
        self.N_pad = _round_up(out_features, 128)
        self.tk = (self.K_pad if self.K_pad <= 2048 else
                   _pick_tile(self.K_pad, (1024, 896, 768, 640, 512, 384, 256, 128)))
        self.tn = _pick_tile(self.N_pad, (512, 384, 256, 128))

        self.w_q = jnp.zeros((self.K_pad, self.N_pad), self.mxu_dtype).at[
            :in_features, :out_features].set(w_s.T.astype(self.mxu_dtype))

        # activation-independent per-channel terms, precomputed once
        pad_n = self.N_pad - out_features
        self.w_colsum = jnp.pad(jnp.sum(w_s, axis=1),
                                (0, pad_n)).reshape(1, self.N_pad)
        self.w_zp_shift = jnp.pad(self.w_zp - QHALF,
                                  (0, pad_n)).reshape(1, self.N_pad)
        self.w_delta_pad = jnp.pad(self.w_delta,
                                   (0, pad_n)).reshape(1, self.N_pad)
        self.bias_pad = jnp.pad(self.bias, (0, pad_n)).reshape(1, self.N_pad)

    def calibrate_act(self, x):
        a_min = jnp.minimum(jnp.min(x), 0.0)
        a_max = jnp.maximum(jnp.max(x), 0.0)
        self.a_delta = jnp.maximum((a_max - a_min) / QMAX, 1e-8)
        self.a_zp = jnp.round(-a_min / self.a_delta)
        self.inv_a_delta = 1.0 / self.a_delta     # reciprocal hoisted off-kernel

    def forward(self, x):
        B, S, K = x.shape
        assert K == self.in_features
        M = B * S
        xf = x.reshape(M, K)

        M_pad = _round_up(M, 32)                  # (32,128) tile-safe for i8/bf16
        tm = _pick_tile(M_pad, (512, 384, 320, 256, 192, 128, 96, 64, 32))
        if (M_pad, self.K_pad) != (M, K):
            # Zero-padding before quantization is exact: padded x quantizes to
            # zp_a' and the padded weight rows are 0; the K_pad term in
            # out_bias cancels the extra zp_a' contributions in xsum.
            xf = jnp.zeros((M_pad, self.K_pad), xf.dtype).at[:M, :K].set(xf)

        a_zp_shift = (self.a_zp - QHALF).astype(jnp.float32)
        out_scale = (self.a_delta * self.w_delta_pad).astype(jnp.float32)
        xsum_scale = out_scale * self.w_zp_shift
        out_bias = (out_scale * (self.K_pad * a_zp_shift * self.w_zp_shift
                                 - a_zp_shift * self.w_colsum)
                    + self.bias_pad)

        x_q, xsum = act_quant_pallas(
            xf,
            jnp.asarray(self.inv_a_delta, jnp.float32).reshape(1, 1),
            jnp.asarray(a_zp_shift, jnp.float32).reshape(1, 1),
            tm=tm, tk=self.tk, store_dtype=self.mxu_dtype)

        y = quantized_matmul_pallas(
            x_q, self.w_q, xsum, out_scale, xsum_scale, out_bias,
            tm=tm, tn=self.tn, tk=self.tk, mxu_dtype=self.mxu_dtype)

        return y[:M, :self.out_features].reshape(B, S, self.out_features)


def reference_forward(model, x):
    """Pure-JAX fake-quant linear matching the QuantizedLinear semantics."""
    B, S, K = x.shape
    xf = x.reshape(B * S, K).astype(jnp.float32)
    x_int = jnp.clip(jnp.round(xf * model.inv_a_delta) + model.a_zp, 0.0, QMAX)
    x_dq = (x_int - model.a_zp) * model.a_delta
    w = model.weight.astype(jnp.float32)
    wd = model.w_delta[:, None]
    wz = model.w_zp[:, None]
    w_int = jnp.clip(jnp.round(w / wd) + wz, 0.0, QMAX)
    w_dq = (w_int - wz) * wd
    y = x_dq @ w_dq.T + model.bias[None, :]
    return y.reshape(B, S, -1)


if __name__ == "__main__":
    key = jax.random.PRNGKey(0)
    k_in, k_model = jax.random.split(key)

    batch, seq, hidden, out = 2, 8, 32, 64
    x = jax.random.normal(k_in, (batch, seq, hidden), jnp.float32)

    model = QuantModelPallas(hidden, out, k_model)
    model.calibrate_act(x)          # set activation delta / zero_point

    y = model.forward(x)
    y = jax.block_until_ready(y)

    y_ref = reference_forward(model, x)
    assert y.shape == (batch, seq, out)
    err = jnp.max(jnp.abs(y - y_ref))
    assert float(err) < 1e-3, f"mismatch vs JAX reference: {err}"

    print("KERNEL_OK")
</pallas_src>

<mosaic_0001>
module attributes {stable_mosaic.version = 11 : i64} {
  func.func @_act_quant_kernel(%arg0: i32, %arg1: i32, %arg2: memref<1x1xf32, #tpu.memory_space<smem>>, %arg3: memref<1x1xf32, #tpu.memory_space<smem>>, %arg4: memref<32x128xf32, #tpu.memory_space<vmem>>, %arg5: memref<32x128xbf16, #tpu.memory_space<vmem>>, %arg6: memref<32x1xf32, #tpu.memory_space<vmem>>) attributes {dimension_semantics = [#tpu.dimension_semantics<parallel>, #tpu.dimension_semantics<arbitrary>], iteration_bounds = array<i64: 1, 1>, scalar_prefetch = 0 : i64, scratch_operands = 0 : i64, tpu.core_type = #tpu.core_type<tc>, window_params = [{transform_indices = @transform_0, window_bounds = array<i64: 1, 1>}, {transform_indices = @transform_1, window_bounds = array<i64: 1, 1>}, {transform_indices = @transform_2, window_bounds = array<i64: 32, 128>}, {transform_indices = @transform_3, window_bounds = array<i64: 32, 128>}, {transform_indices = @transform_4, window_bounds = array<i64: 32, 1>}]} {
    %c0 = arith.constant 0 : index
    %c0_0 = arith.constant 0 : index
    %0 = vector.load %arg4[%c0, %c0_0] : memref<32x128xf32, #tpu.memory_space<vmem>>, vector<32x128xf32>
    %c0_1 = arith.constant 0 : index
    %c0_2 = arith.constant 0 : index
    %1 = memref.load %arg2[%c0_1, %c0_2] : memref<1x1xf32, #tpu.memory_space<smem>>
    %2 = vector.broadcast %1 : f32 to vector<32x128xf32>
    %3 = arith.mulf %0, %2 : vector<32x128xf32>
    %4 = math.roundeven %3 : vector<32x128xf32>
    %c0_3 = arith.constant 0 : index
    %c0_4 = arith.constant 0 : index
    %5 = memref.load %arg3[%c0_3, %c0_4] : memref<1x1xf32, #tpu.memory_space<smem>>
    %6 = vector.broadcast %5 : f32 to vector<32x128xf32>
    %7 = arith.addf %4, %6 : vector<32x128xf32>
    %cst = arith.constant -1.280000e+02 : f32
    %cst_5 = arith.constant 1.270000e+02 : f32
    %8 = vector.broadcast %cst : f32 to vector<32x128xf32>
    %9 = arith.maximumf %8, %7 : vector<32x128xf32>
    %10 = vector.broadcast %cst_5 : f32 to vector<32x128xf32>
    %11 = arith.minimumf %10, %9 : vector<32x128xf32>
    %12 = arith.truncf %11 : vector<32x128xf32> to vector<32x128xbf16>
    %c0_6 = arith.constant 0 : index
    %c0_7 = arith.constant 0 : index
    %13 = vector.load %arg5[%c0_6, %c0_7] : memref<32x128xbf16, #tpu.memory_space<vmem>>, vector<32x128xbf16>
    tpu.vector_store %arg5[%c0_6, %c0_7], %12 {strides = array<i32>} : memref<32x128xbf16, #tpu.memory_space<vmem>>, vector<32x128xbf16>,
    %c0_i32 = arith.constant 0 : i32
    %14 = arith.cmpi eq, %arg1, %c0_i32 : i32
    %15 = arith.extui %14 : i1 to i32
    %c0_i32_8 = arith.constant 0 : i32
    %16 = arith.cmpi ne, %15, %c0_i32_8 : i32
    scf.if %16 {
      %cst_14 = arith.constant 0.000000e+00 : f32
      %22 = vector.broadcast %cst_14 : f32 to vector<32x1xf32>
      %c0_15 = arith.constant 0 : index
      %c0_16 = arith.constant 0 : index
      %23 = vector.load %arg6[%c0_15, %c0_16] : memref<32x1xf32, #tpu.memory_space<vmem>>, vector<32x1xf32>
      tpu.vector_store %arg6[%c0_15, %c0_16], %22 {strides = array<i32>} : memref<32x1xf32, #tpu.memory_space<vmem>>, vector<32x1xf32>,
    } else {
    }
    %c0_9 = arith.constant 0 : index
    %c0_10 = arith.constant 0 : index
    %17 = vector.load %arg6[%c0_9, %c0_10] : memref<32x1xf32, #tpu.memory_space<vmem>>, vector<32x1xf32>
    %cst_11 = arith.constant dense<0.000000e+00> : vector<32xf32>
    %18 = vector.multi_reduction <add>, %11, %cst_11 [1] : vector<32x128xf32> to vector<32xf32>
    %19 = vector.shape_cast %18 : vector<32xf32> to vector<32x1xf32>
    %20 = arith.addf %17, %19 : vector<32x1xf32>
    %c0_12 = arith.constant 0 : index
    %c0_13 = arith.constant 0 : index
    %21 = vector.load %arg6[%c0_12, %c0_13] : memref<32x1xf32, #tpu.memory_space<vmem>>, vector<32x1xf32>
    tpu.vector_store %arg6[%c0_12, %c0_13], %20 {strides = array<i32>} : memref<32x1xf32, #tpu.memory_space<vmem>>, vector<32x1xf32>,
    return
  }
  func.func @transform_0(%arg0: i32, %arg1: i32) -> (i32, i32) {
    %c0_i32 = arith.constant 0 : i32
    %c0_i32_0 = arith.constant 0 : i32
    %c0_i32_1 = arith.constant 0 : i32
    return %c0_i32, %c0_i32_0 : i32, i32
  }
  func.func @transform_1(%arg0: i32, %arg1: i32) -> (i32, i32) {
    %c0_i32 = arith.constant 0 : i32
    %c0_i32_0 = arith.constant 0 : i32
    %c0_i32_1 = arith.constant 0 : i32
    return %c0_i32, %c0_i32_0 : i32, i32
  }
  func.func @transform_2(%arg0: i32, %arg1: i32) -> (i32, i32) {
    %c0_i32 = arith.constant 0 : i32
    return %arg0, %arg1 : i32, i32
  }
  func.func @transform_3(%arg0: i32, %arg1: i32) -> (i32, i32) {
    %c0_i32 = arith.constant 0 : i32
    return %arg0, %arg1 : i32, i32
  }
  func.func @transform_4(%arg0: i32, %arg1: i32) -> (i32, i32) {
    %c0_i32 = arith.constant 0 : i32
    %c0_i32_0 = arith.constant 0 : i32
    return %arg0, %c0_i32 : i32, i32
  }
}

</mosaic_0001>

<bundles_post_ra>
// kernel: tpu_custom_call.1
= control target key start
LH: loop header
LB: loop body
LE: loop exit
PB: predicated region body
PF: predicated region fallthrough
CT: control target
= control target key end

     0   :  { %12 = vsyncpa [#allocation5], 0  ;;  %s334_s0 = inlined_call_operand.<no memory space> [shape: f32[1,1], index: 0, kind: input, shape index: {}]   ;;  %s335_s1 = inlined_call_operand.<no memory space> [shape: f32[1,1], index: 1, kind: input, shape index: {}]   ;;  %s336_s2 = inlined_call_operand.hbm [shape: f32[32,128], index: 2, kind: input, shape index: {}]   ;;  %s337_s3 = inlined_call_operand.hbm [shape: bf16[32,128], index: 3, kind: output, shape index: {0}]   ;;  %s338_s4 = inlined_call_operand.vmem [shape: f32[32,1], index: 4, kind: output, shape index: {1}]  }
   0x1   :  { %13 = vsyncpa [#allocation6], 0  ;;  %s234_s15 = smov [#allocation4]  }
   0x2   :  { %s23_s16 = sshll.u32 %s234_s15, 4  ;;  %s24_s16 = int_to_ptr.vmem [resolvable:$true] %s23_s16 }
   0x3   :  { %s198_s17 = scalar_lea.vmem %s24_s16, 512  ;;  %p203_p1 = scmp.lt.s32.totalorder %s24_s16, %s24_s16 }
   0x4   :  { %p199_p0 = scmp.ne.s32.totalorder %s24_s16, %s198_s17  ;;  %p204_p2 = scmp.lt.s32.totalorder %s198_s17, %s198_s17 }
   0x6   :  { %p205_p3 = por %p204_p2, %p203_p1 }
   0x8   :  { %p206_p4 = pnand %p205_p3, %p199_p0 }
   0xa   :  { %209 = shalt.err (!%p206_p4)
}
   0xb   :  { %s235_s18 = smov 128   ;;  %s236_s19 = smov 8  }
   0xc   :  { %29 = dma.hbm_to_vmem [thread:$0]  %s336_s2, 512, %s24_s16, [#allocation5], %s235_s18, %s235_s18, %s236_s19  }
   0xd   :  { %230 = dma.done.wait [#allocation5], 512  }
   0xe   :  { %231 = vsyncadd [#allocation5], 4294966784  ;;  %vm85_vm0 = vcmask 7168   ;;  %v237_v0 = vmov 0.0   ;;  %v38_v1 = vstv %s334_s0  ;;  %v35_v2 = vld [vmem:[#allocation4 + $0x10] sm:$0xff]  ;;  %v33_v3 = vld [vmem:[#allocation4] sm:$0xff]  ;;  %v48_v26 = vstv %s335_s1 }
   0xf   :  { %88 = vst.msk [vmem:[%s338_s4 + $0x10] sm:$0xff] %vm85_vm0, %v237_v0  ;;  %86 = vst.msk [vmem:[%s338_s4] sm:$0xff] %vm85_vm0, %v237_v0  ;;  %v36_v4 = vld [vmem:[#allocation4 + $0x18] sm:$0xff]  ;;  %v41_v5 = vmul.f32 %v38_v1, %v35_v2  ;;  %v39_v6 = vmul.f32 %v38_v1, %v33_v3  ;;  %v34_v8 = vld [vmem:[#allocation4 + $0x8] sm:$0xff]  ;;  %s238_s1 = smov [#allocation7]  }
  0x10   :  { %87 = vst.msk [vmem:[%s338_s4 + $0x8] sm:$0xff] %vm85_vm0, %v237_v0  ;;  %89 = vst.msk [vmem:[%s338_s4 + $0x18] sm:$0xff] %vm85_vm0, %v237_v0  ;;  %v42_v7 = vmul.f32 %v38_v1, %v36_v4  ;;  %v40_v12 = vmul.f32 %v38_v1, %v34_v8  ;;  %s116_s6 = sshll.u32 %s238_s1, 4  ;;  %s117_s6 = int_to_ptr.vmem [resolvable:$true] %s116_s6 }
  0x11   :  { %v167_v9 = vand.u32 2147483647, %v41_v5  ;;  %v169_v10 = vcvt.f32.s32 %v41_v5  ;;  %v151_v11 = vand.u32 2147483647, %v39_v6  ;;  %v153_v13 = vcvt.f32.s32 %v39_v6  ;;  %s210_s7 = scalar_lea.vmem %s117_s6, 256  ;;  %p215_p6 = scmp.lt.s32.totalorder %s117_s6, %s117_s6 }
  0x12   :  { %v177_v14 = vcvt.f32.s32 %v42_v7  ;;  %v172_v16 = vand.u32 2147483648, %v41_v5  ;;  %v175_v17 = vand.u32 2147483647, %v42_v7  ;;  %v156_v19 = vand.u32 2147483648, %v39_v6  ;;  %p211_p5 = scmp.ne.s32.totalorder %s117_s6, %s210_s7  ;;  %p216_p7 = scmp.lt.s32.totalorder %s210_s7, %s210_s7 }
  0x13   :  { %v170_v15 = vcvt.s32.f32 %v169_v10  ;;  %v154_v18 = vcvt.s32.f32 %v153_v13  ;;  %v180_v21 = vand.u32 2147483648, %v42_v7  ;;  %vm288_vm1 = vcmp.lt.f32.partialorder %v167_v9, 8388608.0 }
  0x14   :  { %v178_v20 = vcvt.s32.f32 %v177_v14  ;;  %vm292_vm2 = vcmp.lt.f32.partialorder %v151_v11, 8388608.0  ;;  %v161_v25 = vcvt.f32.s32 %v40_v12  ;;  %v159_v29 = vand.u32 2147483647, %v40_v12  ;;  %p217_p8 = por %p216_p7, %p215_p6 }
  0x15   :  { %v171_v23 = vand.u32 2147483647, %v170_v15  ;;  %v155_v27 = vand.u32 2147483647, %v154_v18  ;;  %vm176_vm3 = vcmp.lt.f32.partialorder %v175_v17, 8388608.0  ;;  %v164_v32 = vand.u32 2147483648, %v40_v12 }
  0x16   :  { %v179_v28 = vand.u32 2147483647, %v178_v20  ;;  %v162_v31 = vcvt.s32.f32 %v161_v25  ;;  %vm160_vm4 = vcmp.lt.f32.partialorder %v159_v29, 8388608.0  ;;  %p218_p9 = pnand %p217_p8, %p211_p5 }
  0x17   :  { %v173_v30 = vor.u32 %v172_v16, %v171_v23  ;;  %v157_v33 = vor.u32 %v156_v19, %v155_v27 }
  0x18   :  { %v181_v34 = vor.u32 %v180_v21, %v179_v28  ;;  %v163_v36 = vand.u32 2147483647, %v162_v31 }
  0x19   :  { %v174_v35 = vsel %vm288_vm1, %v173_v30, %v41_v5  ;;  %v158_v38 = vsel %vm292_vm2, %v157_v33, %v39_v6 }
  0x1a   :  { %v51_v37 = vadd.f32 %v174_v35, %v48_v26  ;;  %v182_v39 = vsel %vm176_vm3, %v181_v34, %v42_v7  ;;  %v49_v40 = vadd.f32 %v158_v38, %v48_v26  ;;  %v165_v42 = vor.u32 %v164_v32, %v163_v36 }
  0x1b   :  { %v52_v41 = vadd.f32 %v182_v39, %v48_v26 }
  0x1c   :  { %v55_v43 = vmax.f32 %v51_v37, -128.0  ;;  %v53_v44 = vmax.f32 %v49_v40, -128.0  ;;  %v166_v46 = vsel %vm160_vm4, %v165_v42, %v40_v12 }
  0x1d   :  { %v56_v45 = vmax.f32 %v52_v41, -128.0  ;;  %v50_v48 = vadd.f32 %v166_v46, %v48_v26 }
  0x1e   :  { %v59_v47 = vmin.f32 %v55_v43, 127.0  ;;  %v57_v49 = vmin.f32 %v53_v44, 127.0 }
  0x1f   :  { %v60_v50 = vmin.f32 %v56_v45, 127.0  ;;  %v54_v51 = vmax.f32 %v50_v48, -128.0 }
  0x20   :  { %98 = vadd.xlane.f32.xlu1 %v59_v47  ;;  %94 = vadd.xlane.f32.xlu0 %v57_v49 }
  0x21   :  { %v148_v52 = vpack.c.bf16 %v60_v50, %v59_v47  ;;  %v58_v53 = vmin.f32 %v54_v51, 127.0 }
  0x23   :  { %150 = vst [vmem:[#allocation7 + $0x8] sm:$0xff] %v148_v52   ;;  %v143_v54 = vpack.c.bf16 %v58_v53, %v57_v49 }
  0x24   :  { %100 = vadd.xlane.f32.xlu1 %v60_v50  ;;  %96 = vadd.xlane.f32.xlu0 %v58_v53 }
  0x25   :  { %144 = vst [vmem:[#allocation7] sm:$0xff] %v143_v54  }
  0x26   :  { %221 = shalt.err (!%p218_p9)
}
  0x27   :  { %s239_s8 = smov 64   ;;  %s240_s9 = smov 4   ;;  %v92_v55 = vld [vmem:[%s338_s4 + $0x10] sm:$0xff]  ;;  %v90_v56 = vld [vmem:[%s338_s4] sm:$0xff]  ;;  %v93_v61 = vld [vmem:[%s338_s4 + $0x18] sm:$0xff] }
  0x28   :  { %122 = dma.vmem_to_hbm [thread:$0]  %s117_s6, 256, %s337_s3, [#allocation6], %s239_s8, %s239_s8, %s240_s9  }
  0x29   :  { %v91_v62 = vld [vmem:[%s338_s4 + $0x8] sm:$0xff] }
  0xa9   :  { %v99_v57 = vpop.xlane.xlu1 %98  ;;  %v95_v59 = vpop.xlane.xlu0 %94 }
  0xaa   :  { %v104_v58 = vadd.f32 %v99_v57, %v92_v55  ;;  %v102_v60 = vadd.f32 %v95_v59, %v90_v56 }
  0xac   :  { %109 = vst.msk [vmem:[%s338_s4 + $0x10] sm:$0xff] %vm85_vm0, %v104_v58  ;;  %107 = vst.msk [vmem:[%s338_s4] sm:$0xff] %vm85_vm0, %v102_v60 }
  0xad   :  { %v101_v63 = vpop.xlane.xlu1 %100  ;;  %v97_v1 = vpop.xlane.xlu0 %96 }
  0xae   :  { %v105_v0 = vadd.f32 %v101_v63, %v93_v61  ;;  %v103_v2 = vadd.f32 %v97_v1, %v91_v62 }
  0xb0   :  { %110 = vst.msk [vmem:[%s338_s4 + $0x18] sm:$0xff] %vm85_vm0, %v105_v0  ;;  %108 = vst.msk [vmem:[%s338_s4 + $0x8] sm:$0xff] %vm85_vm0, %v103_v2 }
  0xb1   :  { %232 = dma.done.wait [#allocation6], 256  }
  0xb2   :  { %233 = vsyncadd [#allocation6], 4294967040 }
  0xb3   :  { %130 = vsyncpa [#allocation5], 1 }
  0xb4   :  { %131 = vsyncpa [#allocation6], 1 }

</bundles_post_ra>
